<compile_context>
chip_gen: v7x
topology: tpu7x:2x2x1
jax: 0.10.0
libtpu: 0.0.40
codegen_flags: <defaults>
</compile_context>

<pallas_src>
import math
import functools

import jax
import jax.numpy as jnp
from jax.experimental import pallas as pl
from jax.experimental.pallas import tpu as pltpu

EPS = 1e-5   # PyTorch LayerNorm default eps


# ------------------------------------------------------------------ small helpers

def _ln(y, g, b):
    mu = jnp.mean(y, axis=-1, keepdims=True)
    var = jnp.mean(jnp.square(y - mu), axis=-1, keepdims=True)
    return (y - mu) * jax.lax.rsqrt(var + EPS) * g + b


def _vmem_capacity():
    try:
        info = pltpu.get_tpu_info()
        cap = int(getattr(info, "vmem_capacity_bytes", 0) or 0)
        if cap > 0:
            return cap
    except Exception:
        pass
    return 64 * 1024 * 1024          # conservative (v7x per-TC)


def _pick_core_tile(n_rows, s, de, d):
    """Query-row tile for the fused layer kernel, sized from VMEM capacity."""
    cap = _vmem_capacity()
    budget = max(cap // 4, 8 << 20)
    per_row = 4 * s * (4 * de + 8 * d) + 16 * d   # edge in/out (dbl-buffered) + flat f32 temps
    t = max(8, budget // per_row)
    if n_rows >= 32:
        # ensure >= 2 grid steps so the 'parallel' axis can shard across v7x's two TCs
        t = min(t, -(-n_rows // 2))
    if t >= n_rows:
        return n_rows
    t = (t // 16) * 16 if t >= 16 else 8          # 16-row multiples for bf16 sublane packing
    return max(t, 8)


def _core_vmem_limit():
    cap = _vmem_capacity()
    return int(min(cap - (4 << 20), max(32 << 20, int(cap * 0.7))))


def _head_select_mats(d, n_head):
    """0/1 selector E (d, H) with E[j, h] = 1 iff lane j belongs to head h, and its transpose."""
    hd = d // n_head
    head_of_lane = jnp.arange(d, dtype=jnp.int32) // hd
    e = (head_of_lane[:, None] == jnp.arange(n_head, dtype=jnp.int32)[None, :]
         ).astype(jnp.float32)
    return e, jnp.transpose(e)


# ------------------------------------------------------------------ Pallas kernels

def _linear_ln_relu_kernel(x_ref, w_ref, b_ref, g_ref, be_ref, o_ref):
    y = jnp.dot(x_ref[...].astype(w_ref.dtype), w_ref[...],
                preferred_element_type=jnp.float32) + b_ref[...]
    o_ref[...] = jnp.maximum(_ln(y, g_ref[...], be_ref[...]), 0.0)


def _fusion_layer_kernel(*refs, n_head, update_edge):
    """One RelaFusionLayer for a tile of query rows (fully fused)."""
    if update_edge:
        (x_ref, ef_ref, xfull_ref,
         wqst_ref, bqst_ref, we_ref, gmem_ref, bmem_ref,
         wkvp_ref, bkvp_ref, emat_ref, ematt_ref,
         gpe_ref, bepe_ref, gne_ref, bene_ref,
         wo_ref, bo_ref, g2_ref, be2_ref,
         w1_ref, b1_ref, w2_ref, b2_ref, g3_ref, be3_ref,
         xo_ref, eo_ref) = refs
    else:
        (x_ref, ef_ref, xfull_ref,
         wqst_ref, bqst_ref, we_ref, gmem_ref, bmem_ref,
         wkvp_ref, bkvp_ref, emat_ref, ematt_ref,
         wo_ref, bo_ref, g2_ref, be2_ref,
         w1_ref, b1_ref, w2_ref, b2_ref, g3_ref, be3_ref,
         xo_ref) = refs

    T, d = x_ref.shape
    S = xfull_ref.shape[0]
    mxu = wqst_ref.dtype                         # bf16 MXU operands, f32 accumulate

    x_tile = x_ref[...]                          # (T, d)      f32
    ef = ef_ref[...]                             # (T*S, de)   f32, row t*S+s = edge[s, t]

    # fused [Wq*scale | W_src | W_tar] projection of the query-row tile ...
    qst = jnp.dot(x_tile.astype(mxu), wqst_ref[...],
                  preferred_element_type=jnp.float32) + bqst_ref[...]
    q, xs = qst[:, :d], qst[:, d:2 * d]
    # ... and the key-side ("tar") term for all rows (cheap, avoids another launch / HBM trip)
    xt = jnp.dot(xfull_ref[...].astype(mxu), wqst_ref[...][:, 2 * d:],
                 preferred_element_type=jnp.float32)                    # (S, d)

    # memory[t, s] = ReLU(LN(edge[s,t] @ W_edge + x[t] @ W_src + x[s] @ W_tar + b_mem))
    lin = jnp.dot(ef.astype(mxu), we_ref[...], preferred_element_type=jnp.float32)
    lin = lin + (xs[:, None, :] + xt[None, :, :]).reshape(T * S, d)
    mem = jnp.maximum(_ln(lin, gmem_ref[...], bmem_ref[...]), 0.0)      # (T*S, d) f32

    # fused K | V | (edge-proj) matmul -> lane-dense output, split afterwards
    kvp = jnp.dot(mem.astype(mxu), wkvp_ref[...],
                  preferred_element_type=jnp.float32) + bkvp_ref[...]
    k, v = kvp[:, :d], kvp[:, d:2 * d]

    if update_edge:
        pe = jnp.maximum(_ln(kvp[:, 2 * d:], gpe_ref[...], bepe_ref[...]), 0.0)
        eo_ref[...] = _ln(ef + pe, gne_ref[...], bene_ref[...])

    # all-heads attention: scores = (q*k) summed per head via a 0/1 selector matmul,
    # softmax in f32 (EUP reciprocal), probs broadcast back to lanes via the transpose.
    prod = (q[:, None, :] * k.reshape(T, S, d)).reshape(T * S, d)
    sc = jnp.dot(prod, emat_ref[...],
                 preferred_element_type=jnp.float32).reshape(T, S, n_head)
    sc = sc - jnp.max(sc, axis=1, keepdims=True)
    pr = jnp.exp(sc)
    pr = pr * pl.reciprocal(jnp.sum(pr, axis=1, keepdims=True), approx=True)
    pf = jnp.dot(pr.reshape(T * S, n_head), ematt_ref[...],
                 preferred_element_type=jnp.float32)                    # (T*S, d)
    ctx = jnp.sum((pf * v).reshape(T, S, d), axis=1)                    # (T, d)

    # epilogue: Wo + residual + norm2 + FFN + residual + norm3
    xp = jnp.dot(ctx.astype(mxu), wo_ref[...],
                 preferred_element_type=jnp.float32) + bo_ref[...]
    x2 = _ln(x_tile + xp, g2_ref[...], be2_ref[...])
    h = jnp.maximum(jnp.dot(x2.astype(mxu), w1_ref[...],
                            preferred_element_type=jnp.float32) + b1_ref[...], 0.0)
    ff = jnp.dot(h.astype(mxu), w2_ref[...],
                 preferred_element_type=jnp.float32) + b2_ref[...]
    xo_ref[...] = _ln(x2 + ff, g3_ref[...], be3_ref[...])


# ------------------------------------------------------------------ kernel wrappers

def _tiled_call(kernel, tiled_in, resident_in, out_struct, *, max_tile=512):
    rows = tiled_in[0].shape[0]
    tile = rows if rows <= max_tile else max_tile
    grid = (pl.cdiv(rows, tile),)

    def tspec(shape):
        return pl.BlockSpec((tile,) + tuple(shape[1:]),
                            lambda i, _n=len(shape): (i,) + (0,) * (_n - 1))

    def rspec(a):
        return pl.BlockSpec(tuple(a.shape), lambda i, _n=a.ndim: (0,) * _n)

    return pl.pallas_call(
        kernel,
        grid=grid,
        in_specs=[tspec(a.shape) for a in tiled_in] + [rspec(a) for a in resident_in],
        out_specs=tspec(out_struct.shape),
        out_shape=out_struct,
        compiler_params=pltpu.CompilerParams(dimension_semantics=("parallel",)),
    )(*tiled_in, *resident_in)


def linear_ln_relu(x, w, b, g, be):
    out = jax.ShapeDtypeStruct((x.shape[0], w.shape[1]), jnp.float32)
    return _tiled_call(_linear_ln_relu_kernel, [x], [w, b, g, be], out)


def rela_fusion_layer_pallas(x, edge_flat, p, update_edge, n_head):
    """x: (N, d) f32; edge_flat: (N*N, de) f32 with row i*N+s = edge[s, i]."""
    N, d = x.shape
    de = edge_flat.shape[-1]
    S = N
    tile = _pick_core_tile(N, S, de, d)
    steps = -(-N // tile)
    e_mat, e_mat_t = _head_select_mats(d, n_head)

    residents = [x, p['w_qst'], p['b_qst'], p['w_e'], p['g_mem'], p['be_mem'],
                 p['w_kvp'], p['b_kvp'], e_mat, e_mat_t]
    if update_edge:
        residents += [p['g_pe'], p['be_pe'], p['g_ne'], p['be_ne']]
    residents += [p['wo'], p['bo'], p['g2'], p['be2'],
                  p['w1'], p['b1'], p['w2'], p['b2'], p['g3'], p['be3']]

    def _res_spec(a):
        return pl.BlockSpec(tuple(a.shape), lambda i, _n=a.ndim: (0,) * _n)

    in_specs = ([pl.BlockSpec((tile, d), lambda i: (i, 0)),
                 pl.BlockSpec((tile * S, de), lambda i: (i, 0))]
                + [_res_spec(a) for a in residents])

    out_shape = [jax.ShapeDtypeStruct((N, d), jnp.float32)]
    out_specs = [pl.BlockSpec((tile, d), lambda i: (i, 0))]
    if update_edge:
        out_shape.append(jax.ShapeDtypeStruct((N * S, de), jnp.float32))
        out_specs.append(pl.BlockSpec((tile * S, de), lambda i: (i, 0)))

    kv_w = 2 * d + (de if update_edge else 0)
    flops = (2 * N * S * d * (de + kv_w + 2 * n_head)        # memory + K/V/PE + head sums
             + 4 * N * S * d                                 # q*k and p*v elementwise
             + 2 * N * d * 3 * d + steps * 2 * S * d * d     # fused qst / tar projections
             + 2 * N * (5 * d * d))                          # Wo + FFN
    weight_bytes = sum(int(a.size) * int(a.dtype.itemsize) for a in residents)
    bytes_accessed = (4 * N * S * de * (2 if update_edge else 1)
                      + 4 * 2 * N * d + steps * weight_bytes)
    cost = pl.CostEstimate(flops=int(flops),
                           transcendentals=int(N * S * (n_head + 2) + 6 * N),
                           bytes_accessed=int(bytes_accessed))

    outs = pl.pallas_call(
        functools.partial(_fusion_layer_kernel, n_head=n_head, update_edge=update_edge),
        grid=(steps,),
        in_specs=in_specs,
        out_specs=tuple(out_specs) if update_edge else out_specs[0],
        out_shape=tuple(out_shape) if update_edge else out_shape[0],
        compiler_params=pltpu.CompilerParams(
            dimension_semantics=("parallel",),
            vmem_limit_bytes=_core_vmem_limit()),
        cost_estimate=cost,
    )(x, edge_flat, *residents)

    if update_edge:
        return outs[0], outs[1]
    return outs, edge_flat


# ------------------------------------------------------------------ Pallas forward

def fusion_net_forward_pallas(params, cfg, actors, actor_idcs, lanes, lane_idcs, rpe_prep):
    d_model, d_rpe = cfg['d_embed'], cfg['d_rpe']
    actors_p = linear_ln_relu(actors, *params['proj_actor'])
    lanes_p = linear_ln_relu(lanes, *params['proj_lane'])

    # TODO(synk): pad scenes to bucketed token counts and batch/vmap this loop so the layer
    #             stack is traced once and the 'parallel' grid axis gets a real extent.
    wr, br, gr, ber = params['proj_rpe']
    actors_new, lanes_new, cls_new = [], [], []
    for a_idcs, l_idcs, rpes in zip(actor_idcs, lane_idcs, rpe_prep):
        tokens = jnp.concatenate([actors_p[a_idcs], lanes_p[l_idcs]], axis=0)
        n_tok = tokens.shape[0]
        x = jnp.concatenate([tokens, jnp.zeros((1, d_model), jnp.float32)], axis=0)  # + cls
        N = n_tok + 1
        # rpe projection (K = d_rpe_in = 5) in plain XLA: a Pallas launch is pure overhead here.
        # Transposed-flat edge convention: row i*N + s holds edge[s, i] (keys of query i contiguous).
        rpe_in_t = jnp.transpose(rpes['scene'], (2, 1, 0)).reshape(n_tok * n_tok, -1)
        rpe_t = jnp.maximum(_ln(rpe_in_t @ wr + br, gr, ber), 0.0).reshape(n_tok, n_tok, d_rpe)
        edge_flat = jnp.pad(rpe_t, ((0, 1), (0, 1), (0, 0))).reshape(N * N, d_rpe)
        for li in range(cfg['n_scene_layer']):
            upd = cfg['update_edge'] and (li != cfg['n_scene_layer'] - 1)
            x, edge_flat = rela_fusion_layer_pallas(
                x, edge_flat, params['layers'][li], upd, cfg['n_scene_head'])
        na = len(a_idcs)
        actors_new.append(x[:na]); lanes_new.append(x[na:-1]); cls_new.append(x[-1:])
    return (jnp.concatenate(actors_new, axis=0),
            jnp.concatenate(lanes_new, axis=0),
            jnp.concatenate(cls_new, axis=0))


# ------------------------------------------------------------------ pure-JAX reference
# dt = matmul-operand dtype: f32 -> strict module math; bf16 -> mirrors kernel MXU precision.

def _mm(a, b, dt):
    return jnp.dot(a.astype(dt), b.astype(dt), preferred_element_type=jnp.float32)


def _plr_ref(x, w, b, g, be, dt):
    return jnp.maximum(_ln(_mm(x, w, dt) + b, g, be), 0.0)


def _ref_layer(x, edge, p, update_edge, n_head, dt):
    N, d = x.shape
    de = edge.shape[-1]
    src = jnp.broadcast_to(x[None, :, :], (N, N, d))
    tar = jnp.broadcast_to(x[:, None, :], (N, N, d))
    cat = jnp.concatenate([edge, src, tar], axis=-1).reshape(N * N, de + 2 * d)
    memory = jnp.maximum(_ln(_mm(cat, p['w_mem'], dt) + p['b_mem'],
                             p['g_mem'], p['be_mem']), 0.0).reshape(N, N, d)
    if update_edge:
        pe = jnp.maximum(_ln(_mm(memory.reshape(N * N, d), p['w_pe'], dt) + p['b_pe'],
                             p['g_pe'], p['be_pe']), 0.0)
        edge = _ln(edge.reshape(N * N, de) + pe, p['g_ne'], p['be_ne']).reshape(N, N, de)
    q = _mm(x, p['wq'], dt) + p['bq']
    memT = jnp.transpose(memory, (1, 0, 2)).reshape(N * N, d)
    k = (_mm(memT, p['wk'], dt) + p['bk']).reshape(N, N, d)
    v = (_mm(memT, p['wv'], dt) + p['bv']).reshape(N, N, d)
    hd = d // n_head
    qh = q.reshape(N, n_head, hd)
    kh = k.reshape(N, N, n_head, hd)
    vh = v.reshape(N, N, n_head, hd)
    s = jnp.einsum('nhe,nshe->nhs', qh, kh) / math.sqrt(hd)
    pa = jax.nn.softmax(s, axis=-1)
    ctx = jnp.einsum('nhs,nshe->nhe', pa, vh).reshape(N, d)
    x2 = _ln(x + _mm(ctx, p['wo'], dt) + p['bo'], p['g2'], p['be2'])
    ff = _mm(jnp.maximum(_mm(x2, p['w1'], dt) + p['b1'], 0.0), p['w2'], dt) + p['b2']
    return _ln(x2 + ff, p['g3'], p['be3']), edge


def fusion_net_forward_ref(params, cfg, actors, actor_idcs, lanes, lane_idcs, rpe_prep,
                           dt=jnp.float32):
    d, de = cfg['d_embed'], cfg['d_rpe']
    actors_p = _plr_ref(actors, *params['proj_actor'], dt)
    lanes_p = _plr_ref(lanes, *params['proj_lane'], dt)
    A, L, C = [], [], []
    for a_idcs, l_idcs, rpes in zip(actor_idcs, lane_idcs, rpe_prep):
        tokens = jnp.concatenate([actors_p[a_idcs], lanes_p[l_idcs]], axis=0)
        n_tok = tokens.shape[0]
        x = jnp.concatenate([tokens, jnp.zeros((1, d), jnp.float32)], axis=0)
        N = n_tok + 1
        rpe_in = jnp.transpose(rpes['scene'], (1, 2, 0)).reshape(n_tok * n_tok, -1)
        rpe = _plr_ref(rpe_in, *params['proj_rpe'], jnp.float32).reshape(n_tok, n_tok, de)
        edge = jnp.pad(rpe, ((0, 1), (0, 1), (0, 0)))
        for li in range(cfg['n_scene_layer']):
            upd = cfg['update_edge'] and (li != cfg['n_scene_layer'] - 1)
            x, edge = _ref_layer(x, edge, params['layers'][li], upd, cfg['n_scene_head'], dt)
        na = len(a_idcs)
        A.append(x[:na]); L.append(x[na:-1]); C.append(x[-1:])
    return jnp.concatenate(A, 0), jnp.concatenate(L, 0), jnp.concatenate(C, 0)


# ------------------------------------------------------------------ parameters

def _init_linear(key, d_in, d_out):
    k1, k2 = jax.random.split(key)
    w = jax.random.normal(k1, (d_in, d_out), jnp.float32) / math.sqrt(d_in)
    b = jax.random.normal(k2, (1, d_out), jnp.float32) * 0.02
    return w, b


def _init_ln(d):
    return jnp.ones((1, d), jnp.float32), jnp.zeros((1, d), jnp.float32)


def init_params(key, cfg):
    d, de = cfg['d_embed'], cfg['d_rpe']
    d_ffn = 2 * d                      # RelaFusionNet builds layers with d_ffn = d_model * 2
    keys = jax.random.split(key, 3 + cfg['n_scene_layer'])
    P = {}
    for name, kk, din, dout in (('proj_actor', keys[0], cfg['d_actor'], d),
                                ('proj_lane', keys[1], cfg['d_lane'], d),
                                ('proj_rpe', keys[2], cfg['d_rpe_in'], de)):
        w, b = _init_linear(kk, din, dout)
        P[name] = (w, b, *_init_ln(dout))
    layers = []
    for li in range(cfg['n_scene_layer']):
        lk = jax.random.split(keys[3 + li], 8)
        p = {}
        p['w_mem'], p['b_mem'] = _init_linear(lk[0], de + 2 * d, d)
        p['g_mem'], p['be_mem'] = _init_ln(d)
        p['w_pe'], p['b_pe'] = _init_linear(lk[1], d, de)
        p['g_pe'], p['be_pe'] = _init_ln(de)
        p['g_ne'], p['be_ne'] = _init_ln(de)
        p['wq'], p['bq'] = _init_linear(lk[2], d, d)
        p['wk'], p['bk'] = _init_linear(lk[3], d, d)
        p['wv'], p['bv'] = _init_linear(lk[4], d, d)
        p['wo'], p['bo'] = _init_linear(lk[5], d, d)
        p['w1'], p['b1'] = _init_linear(lk[6], d, d_ffn)
        p['w2'], p['b2'] = _init_linear(lk[7], d_ffn, d)
        p['g2'], p['be2'] = _init_ln(d)
        p['g3'], p['be3'] = _init_ln(d)
        layers.append(p)
    P['layers'] = layers
    return P


def prepare_pallas_params(params, cfg):
    """Derive the fused / split / bf16 weights used by the Pallas path."""
    d, de = cfg['d_embed'], cfg['d_rpe']
    n_head, n_layer = cfg['n_scene_head'], cfg['n_scene_layer']
    scale = 1.0 / math.sqrt(d // n_head)          # folded into the Wq block
    bf = jnp.bfloat16
    out = {}
    for k in ('proj_actor', 'proj_lane'):
        w, b, g, be = params[k]
        out[k] = (w.astype(bf), b, g, be)
    out['proj_rpe'] = params['proj_rpe']          # stays f32 (plain-XLA path)
    layers = []
    for li, p in enumerate(params['layers']):
        upd = cfg['update_edge'] and (li != n_layer - 1)
        q = {}
        w_mem = p['w_mem']                        # rows: [edge | src | tar]
        q['w_e'] = w_mem[:de].astype(bf)
        w_src, w_tar = w_mem[de:de + d], w_mem[de + d:]
        q['w_qst'] = jnp.concatenate([p['wq'] * scale, w_src, w_tar], axis=1).astype(bf)
        q['b_qst'] = jnp.concatenate([p['bq'] * scale, p['b_mem'],
                                      jnp.zeros((1, d), jnp.float32)], axis=1)
        if upd:
            q['w_kvp'] = jnp.concatenate([p['wk'], p['wv'], p['w_pe']], axis=1).astype(bf)
            q['b_kvp'] = jnp.concatenate([p['bk'], p['bv'], p['b_pe']], axis=1)
            for k in ('g_pe', 'be_pe', 'g_ne', 'be_ne'):
                q[k] = p[k]
        else:
            q['w_kvp'] = jnp.concatenate([p['wk'], p['wv']], axis=1).astype(bf)
            q['b_kvp'] = jnp.concatenate([p['bk'], p['bv']], axis=1)
        q['wo'] = p['wo'].astype(bf); q['bo'] = p['bo']
        q['w1'] = p['w1'].astype(bf); q['b1'] = p['b1']
        q['w2'] = p['w2'].astype(bf); q['b2'] = p['b2']
        for k in ('g_mem', 'be_mem', 'g2', 'be2', 'g3', 'be3'):
            q[k] = p[k]
        layers.append(q)
    out['layers'] = layers
    return out


# ------------------------------------------------------------------ main

if __name__ == "__main__":
    cfg = dict(d_actor=24, d_lane=16, d_rpe_in=5, d_embed=64, d_rpe=32,
               n_scene_head=4, n_scene_layer=2, dropout=0.1, update_edge=True)

    key = jax.random.PRNGKey(0)
    kp, ka, kl, kr0, kr1 = jax.random.split(key, 5)
    params = init_params(kp, cfg)
    pparams = prepare_pallas_params(params, cfg)

    # 2 scenes: scene 0 has 3 actors + 4 lanes, scene 1 has 2 actors + 5 lanes (7 tok + cls = 8)
    actors = jax.random.normal(ka, (5, cfg['d_actor']), jnp.float32)
    lanes = jax.random.normal(kl, (9, cfg['d_lane']), jnp.float32)
    actor_idcs = [jnp.array([0, 1, 2], jnp.int32), jnp.array([3, 4], jnp.int32)]
    lane_idcs = [jnp.array([0, 1, 2, 3], jnp.int32), jnp.array([4, 5, 6, 7, 8], jnp.int32)]
    rpe_prep = [
        {'scene': jax.random.normal(kr0, (cfg['d_rpe_in'], 7, 7), jnp.float32)},
        {'scene': jax.random.normal(kr1, (cfg['d_rpe_in'], 7, 7), jnp.float32)},
    ]

    out_a, out_l, out_c = fusion_net_forward_pallas(
        pparams, cfg, actors, actor_idcs, lanes, lane_idcs, rpe_prep)
    jax.block_until_ready((out_a, out_l, out_c))

    # reference #1: module math with matmul operands in bf16 (mirrors the kernel's MXU precision)
    r16 = fusion_net_forward_ref(params, cfg, actors, actor_idcs, lanes, lane_idcs,
                                 rpe_prep, dt=jnp.bfloat16)
    # reference #2: strict f32 module math (the spec); loose bound covers bf16 matmul rounding
    r32 = fusion_net_forward_ref(params, cfg, actors, actor_idcs, lanes, lane_idcs,
                                 rpe_prep, dt=jnp.float32)

    assert out_a.shape == (5, cfg['d_embed'])
    assert out_l.shape == (9, cfg['d_embed'])
    assert out_c.shape == (2, cfg['d_embed'])
    for o, r in zip((out_a, out_l, out_c), r16):
        err = float(jnp.max(jnp.abs(o - r)))
        assert err < 2e-2, f"kernel mismatch vs bf16-matmul reference: {err}"
    for o, r in zip((out_a, out_l, out_c), r32):
        err = float(jnp.max(jnp.abs(o - r)))
        assert err < 2e-1, f"kernel drifted from f32 reference: {err}"

    print("KERNEL_OK")
</pallas_src>

<mosaic_0001>
module attributes {stable_mosaic.version = 11 : i64} {
  func.func @_linear_ln_relu_kernel(%arg0: i32, %arg1: memref<5x24xf32, #tpu.memory_space<vmem>>, %arg2: memref<24x64xbf16, #tpu.memory_space<vmem>>, %arg3: memref<1x64xf32, #tpu.memory_space<vmem>>, %arg4: memref<1x64xf32, #tpu.memory_space<vmem>>, %arg5: memref<1x64xf32, #tpu.memory_space<vmem>>, %arg6: memref<5x64xf32, #tpu.memory_space<vmem>>) attributes {dimension_semantics = [#tpu.dimension_semantics<parallel>], iteration_bounds = array<i64: 1>, scalar_prefetch = 0 : i64, scratch_operands = 0 : i64, tpu.core_type = #tpu.core_type<tc>, window_params = [{transform_indices = @transform_0, window_bounds = array<i64: 5, 24>}, {pipeline_mode = #tpu.pipeline_mode<synchronous>, transform_indices = @transform_1, window_bounds = array<i64: 24, 64>}, {pipeline_mode = #tpu.pipeline_mode<synchronous>, transform_indices = @transform_2, window_bounds = array<i64: 1, 64>}, {pipeline_mode = #tpu.pipeline_mode<synchronous>, transform_indices = @transform_3, window_bounds = array<i64: 1, 64>}, {pipeline_mode = #tpu.pipeline_mode<synchronous>, transform_indices = @transform_4, window_bounds = array<i64: 1, 64>}, {transform_indices = @transform_5, window_bounds = array<i64: 5, 64>}]} {
    %c0 = arith.constant 0 : index
    %c0_0 = arith.constant 0 : index
    %0 = vector.load %arg1[%c0, %c0_0] : memref<5x24xf32, #tpu.memory_space<vmem>>, vector<5x24xf32>
    %1 = arith.truncf %0 : vector<5x24xf32> to vector<5x24xbf16>
    %c0_1 = arith.constant 0 : index
    %c0_2 = arith.constant 0 : index
    %2 = vector.load %arg2[%c0_1, %c0_2] : memref<24x64xbf16, #tpu.memory_space<vmem>>, vector<24x64xbf16>
    %cst = arith.constant dense<0.000000e+00> : vector<5x64xf32>
    %3 = tpu.matmul %1, %2, %cst {dimension_numbers = #tpu.dot_dimension_numbers<[1], [0], [0], [1], [0, 0, 1, 1], [], []>} : vector<5x24xbf16>, vector<24x64xbf16>, vector<5x64xf32> -> vector<5x64xf32>
    %c0_3 = arith.constant 0 : index
    %c0_4 = arith.constant 0 : index
    %4 = vector.load %arg3[%c0_3, %c0_4] : memref<1x64xf32, #tpu.memory_space<vmem>>, vector<1x64xf32>
    %5 = vector.broadcast %4 : vector<1x64xf32> to vector<5x64xf32>
    %6 = arith.addf %3, %5 : vector<5x64xf32>
    %c0_5 = arith.constant 0 : index
    %c0_6 = arith.constant 0 : index
    %7 = vector.load %arg4[%c0_5, %c0_6] : memref<1x64xf32, #tpu.memory_space<vmem>>, vector<1x64xf32>
    %c0_7 = arith.constant 0 : index
    %c0_8 = arith.constant 0 : index
    %8 = vector.load %arg5[%c0_7, %c0_8] : memref<1x64xf32, #tpu.memory_space<vmem>>, vector<1x64xf32>
    %cst_9 = arith.constant dense<0.000000e+00> : vector<5xf32>
    %9 = vector.multi_reduction <add>, %6, %cst_9 [1] : vector<5x64xf32> to vector<5xf32>
    %10 = vector.shape_cast %9 : vector<5xf32> to vector<5x1xf32>
    %cst_10 = arith.constant 6.400000e+01 : f32
    %11 = vector.broadcast %cst_10 : f32 to vector<5x1xf32>
    %12 = arith.divf %10, %11 : vector<5x1xf32>
    %13 = vector.broadcast %12 : vector<5x1xf32> to vector<5x64xf32>
    %14 = arith.subf %6, %13 : vector<5x64xf32>
    %15 = arith.mulf %14, %14 : vector<5x64xf32>
    %cst_11 = arith.constant dense<0.000000e+00> : vector<5xf32>
    %16 = vector.multi_reduction <add>, %15, %cst_11 [1] : vector<5x64xf32> to vector<5xf32>
    %17 = vector.shape_cast %16 : vector<5xf32> to vector<5x1xf32>
    %cst_12 = arith.constant 6.400000e+01 : f32
    %18 = vector.broadcast %cst_12 : f32 to vector<5x1xf32>
    %19 = arith.divf %17, %18 : vector<5x1xf32>
    %20 = vector.broadcast %12 : vector<5x1xf32> to vector<5x64xf32>
    %21 = arith.subf %6, %20 : vector<5x64xf32>
    %cst_13 = arith.constant 9.99999974E-6 : f32
    %22 = vector.broadcast %cst_13 : f32 to vector<5x1xf32>
    %23 = arith.addf %19, %22 : vector<5x1xf32>
    %24 = math.rsqrt %23 : vector<5x1xf32>
    %25 = vector.broadcast %24 : vector<5x1xf32> to vector<5x64xf32>
    %26 = arith.mulf %21, %25 : vector<5x64xf32>
    %27 = vector.broadcast %7 : vector<1x64xf32> to vector<5x64xf32>
    %28 = arith.mulf %26, %27 : vector<5x64xf32>
    %29 = vector.broadcast %8 : vector<1x64xf32> to vector<5x64xf32>
    %30 = arith.addf %28, %29 : vector<5x64xf32>
    %cst_14 = arith.constant 0.000000e+00 : f32
    %31 = vector.broadcast %cst_14 : f32 to vector<5x64xf32>
    %32 = arith.maximumf %30, %31 : vector<5x64xf32>
    %c0_15 = arith.constant 0 : index
    %c0_16 = arith.constant 0 : index
    %33 = vector.load %arg6[%c0_15, %c0_16] : memref<5x64xf32, #tpu.memory_space<vmem>>, vector<5x64xf32>
    tpu.vector_store %arg6[%c0_15, %c0_16], %32 {strides = array<i32>} : memref<5x64xf32, #tpu.memory_space<vmem>>, vector<5x64xf32>,
    return
  }
  func.func @transform_0(%arg0: i32) -> (i32, i32) {
    %c0_i32 = arith.constant 0 : i32
    %c0_i32_0 = arith.constant 0 : i32
    return %arg0, %c0_i32 : i32, i32
  }
  func.func @transform_1(%arg0: i32) -> (i32, i32) {
    %c0_i32 = arith.constant 0 : i32
    %c0_i32_0 = arith.constant 0 : i32
    %c0_i32_1 = arith.constant 0 : i32
    return %c0_i32, %c0_i32_0 : i32, i32
  }
  func.func @transform_2(%arg0: i32) -> (i32, i32) {
    %c0_i32 = arith.constant 0 : i32
    %c0_i32_0 = arith.constant 0 : i32
    %c0_i32_1 = arith.constant 0 : i32
    return %c0_i32, %c0_i32_0 : i32, i32
  }
  func.func @transform_3(%arg0: i32) -> (i32, i32) {
    %c0_i32 = arith.constant 0 : i32
    %c0_i32_0 = arith.constant 0 : i32
    %c0_i32_1 = arith.constant 0 : i32
    return %c0_i32, %c0_i32_0 : i32, i32
  }
  func.func @transform_4(%arg0: i32) -> (i32, i32) {
    %c0_i32 = arith.constant 0 : i32
    %c0_i32_0 = arith.constant 0 : i32
    %c0_i32_1 = arith.constant 0 : i32
    return %c0_i32, %c0_i32_0 : i32, i32
  }
  func.func @transform_5(%arg0: i32) -> (i32, i32) {
    %c0_i32 = arith.constant 0 : i32
    %c0_i32_0 = arith.constant 0 : i32
    return %arg0, %c0_i32 : i32, i32
  }
}

</mosaic_0001>

<bundles_post_ra>
// kernel: tpu_custom_call.1
= control target key start
LH: loop header
LB: loop body
LE: loop exit
PB: predicated region body
PF: predicated region fallthrough
CT: control target
= control target key end

     0   :  { %10 = vsyncpa [#allocation3], 0  ;;  %s358_s0 = inlined_call_operand.hbm [shape: f32[5,24], index: 0, kind: input, shape index: {}]   ;;  %s359_s1 = inlined_call_operand.hbm [shape: bf16[24,64], index: 1, kind: input, shape index: {}]   ;;  %s360_s2 = inlined_call_operand.vmem [shape: f32[1,64], index: 2, kind: input, shape index: {}]   ;;  %s361_s3 = inlined_call_operand.vmem [shape: f32[1,64], index: 3, kind: input, shape index: {}]   ;;  %s362_s4 = inlined_call_operand.vmem [shape: f32[1,64], index: 4, kind: input, shape index: {}]   ;;  %s363_s5 = inlined_call_operand.hbm [shape: f32[5,64], index: 5, kind: output, shape index: {}]  }
   0x1   :  { %11 = vsyncpa [#allocation6], 0 }
   0x2   :  { %12 = vsyncpa [#allocation4], 0  ;;  %s266_s18 = smov [#allocation2]   ;;  %s267_s20 = smov [#allocation5]  }
   0x3   :  { %s19_s19 = sshll.u32 %s266_s18, 4  ;;  %s28_s21 = sshll.u32 %s267_s20, 4  ;;  %s20_s19 = int_to_ptr.vmem [resolvable:$true] %s19_s19  ;;  %s303_s21 = int_to_ptr.vmem [resolvable:$true] %s28_s21 }
   0x4   :  { %s194_s24 = scalar_lea.hbm %s358_s0, 128 }
   0x5   :  { %p195_p0 = scmp.ne.s32.totalorder %s358_s0, %s194_s24  ;;  %p198_p1 = scmp.lt.u32.totalorder %s194_s24, %s358_s0 }
   0x7   :  { %p200_p2 = pnand %p198_p1, %p195_p0 }
   0x9   :  { %203 = shalt.err (!%p200_p2)
}
   0xa   :  { %s204_s29 = scalar_lea.vmem %s20_s19, 128  ;;  %p209_p4 = scmp.lt.s32.totalorder %s20_s19, %s20_s19 }
   0xb   :  { %p205_p3 = scmp.ne.s32.totalorder %s20_s19, %s204_s29  ;;  %p210_p5 = scmp.lt.s32.totalorder %s204_s29, %s204_s29 }
   0xd   :  { %p211_p6 = por %p210_p5, %p209_p4 }
   0xf   :  { %p212_p7 = pnand %p211_p6, %p205_p3 }
  0x11   :  { %215 = shalt.err (!%p212_p7)
}
  0x12   :  { %22 = dma.hbm_to_vmem [thread:$0]  %s358_s0, 128, %s20_s19, [#allocation3]  }
  0x13   :  { %s216_s9 = scalar_lea.hbm %s359_s1, 192 }
  0x14   :  { %p217_p8 = scmp.ne.s32.totalorder %s359_s1, %s216_s9  ;;  %p220_p9 = scmp.lt.u32.totalorder %s216_s9, %s359_s1 }
  0x16   :  { %p222_p10 = pnand %p220_p9, %p217_p8 }
  0x18   :  { %225 = shalt.err (!%p222_p10)
}
  0x19   :  { %s226_s14 = scalar_lea.vmem %s303_s21, 192  ;;  %p231_p12 = scmp.lt.s32.totalorder %s303_s21, %s303_s21 }
  0x1a   :  { %p227_p11 = scmp.ne.s32.totalorder %s303_s21, %s226_s14  ;;  %p232_p13 = scmp.lt.s32.totalorder %s226_s14, %s226_s14 }
  0x1c   :  { %p233_p0 = por %p232_p13, %p231_p12 }
  0x1e   :  { %p234_p1 = pnand %p233_p0, %p227_p11 }
  0x20   :  { %237 = shalt.err (!%p234_p1)
}
  0x21   :  { %s268_s0 = smov 64   ;;  %s269_s15 = smov 4  }
  0x22   :  { %34 = dma.hbm_to_vmem [thread:$0]  %s359_s1, 192, %s303_s21, [#allocation6], %s268_s0, %s268_s0, %s269_s15  }
  0x23   :  { %260 = dma.done.wait [#allocation3], 128  }
  0x24   :  { %261 = vsyncadd [#allocation3], 4294967168 }
  0x25   :  { %262 = dma.done.wait [#allocation6], 192  }
  0x26   :  { %263 = vsyncadd [#allocation6], 4294967104  ;;  %v270_v0 = vmov 0.0   ;;  %vm271_vm0 = vmmov 0   ;;  %v190_v1 = vld [vmem:[#allocation5] sm:$0xff]   ;;  %vm73_vm1 = vcmask 1043456  }
  0x27   :  { %175 = vmatprep.subr.bf16.mxu0 %v270_v0  ;;  %179 = vmatprep.mubr.msk.bf16.mxu0 %vm271_vm0, %v270_v0  ;;  %v191_v2 = vld [vmem:[#allocation5 + $0x8] ss:$0 sps:$4 sm:$0xff]   ;;  %v48_v3 = vld [vmem:[#allocation2] sm:$0x1f]  ;;  %vm69_vm2 = vcmask 195584   ;;  %vm119_vm3 = vcmask 520192  }
  0x28   :  { %176 = vmatpush3.bf16.msra.mxu0 %v190_v1  ;;  %v75_v4 = vsel %vm73_vm1, %v191_v2, 0  ;;  %v49_v5 = vpack.c.bf16 %v48_v3, %v48_v3  ;;  %v166_v6 = vld [vmem:[%s360_s2] ss:$0 sm:$0xff]  ;;  %s272_s22 = smov [#allocation7]  }
  0x29   :  { %177 = vmatprep.subr.bf16.mxu0 %v270_v0  ;;  %v170_v22 = vld [vmem:[%s361_s3] ss:$0 sm:$0xff]  ;;  %s156_s23 = sshll.u32 %s272_s22, 4  ;;  %s157_s23 = int_to_ptr.vmem [resolvable:$true] %s156_s23 }
  0x2a   :  { %v171_v24 = vld [vmem:[%s362_s4] ss:$0 sm:$0xff]  ;;  %s238_s24 = scalar_lea.vmem %s157_s23, 128  ;;  %p243_p3 = scmp.lt.s32.totalorder %s157_s23, %s157_s23 }
  0x2b   :  { %p239_p2 = scmp.ne.s32.totalorder %s157_s23, %s238_s24  ;;  %p244_p4 = scmp.lt.s32.totalorder %s238_s24, %s238_s24 }
  0x2c   :  { %178 = vmatpush3.bf16.msra.mxu0 %v75_v4 }
  0x2d   :  { %p245_p5 = por %p244_p4, %p243_p3 }
  0x2f   :  { %180 = vmatmul.mubr.msk.bf16.vlgmr.msra.gmra.mrb[0].mxu0 %vm69_vm2, %v49_v5  ;;  %p246_p6 = pnand %p245_p5, %p239_p2 }
 0x102   :  { %v111_v7 = vpop.f32.mrb[0].mxu0 }
 0x103   :  { %v112_v8 = vadd.f32 %v166_v6, %v111_v7  ;;  %v181_v9 = vpop.f32.mrb[1].mxu0 }
 0x104   :  { %v114_v10 = vpop.f32.mrb[2].mxu0 }
 0x105   :  { %v182_v11 = vpop.f32.mrb[3].mxu0  ;;  %v120_v12 = vsel %vm119_vm3, %v112_v8, 0.0 }
 0x106   :  { %121 = vadd.xlane.f32.xlu0 %v120_v12 }
 0x193   :  { %v122_v13 = vpop.xlane.xlu0 %121 }
 0x194   :  { %v124_v14 = vmul.f32 0.015625, %v122_v13 }
 0x196   :  { %v125_v15 = vsub.f32 %v112_v8, %v124_v14 }
 0x198   :  { %v126_v16 = vmul.f32 %v125_v15, %v125_v15 }
 0x19a   :  { %v127_v17 = vsel %vm119_vm3, %v126_v16, 0.0 }
 0x19b   :  { %128 = vadd.xlane.f32.xlu0 %v127_v17 }
 0x228   :  { %v129_v18 = vpop.xlane.xlu0 %128 }
 0x229   :  { %v130_v19 = vmul.f32 0.015625, %v129_v18 }
 0x22b   :  { %v131_v20 = vadd.f32 1e-05, %v130_v19 }
 0x22d   :  { %192 = vrsqrt.f32 %v131_v20 }
 0x237   :  { %v193_v21 = vpop.eup %192 }
 0x238   :  { %v133_v23 = vmul.f32 %v193_v21, %v125_v15 }
 0x23a   :  { %v140_v25 = vmul.f32 %v170_v22, %v133_v23 }
 0x23c   :  { %v147_v26 = vadd.f32 %v171_v24, %v140_v25 }
 0x23e   :  { %v148_v27 = vmax.f32 %v147_v26, 0.0 }
 0x240   :  { %149 = vst.msk [vmem:[#allocation7] sm:$0x1f] %vm119_vm3, %v148_v27 }
 0x241   :  { %249 = shalt.err (!%p246_p6)
}
 0x242   :  { %s250_s26 = scalar_lea.hbm %s363_s5, 128 }
 0x243   :  { %p251_p7 = scmp.ne.s32.totalorder %s363_s5, %s250_s26  ;;  %p254_p8 = scmp.lt.u32.totalorder %s250_s26, %s363_s5 }
 0x245   :  { %p256_p9 = pnand %p254_p8, %p251_p7 }
 0x247   :  { %259 = shalt.err (!%p256_p9)
}
 0x248   :  { %159 = dma.vmem_to_hbm [thread:$0]  %s157_s23, 128, %s363_s5, [#allocation4]  }
 0x249   :  { %264 = dma.done.wait [#allocation4], 128  }
 0x24a   :  { %265 = vsyncadd [#allocation4], 4294967168 }
 0x24b   :  { %163 = vsyncpa [#allocation3], 1 }
 0x24c   :  { %164 = vsyncpa [#allocation6], 1 }
 0x24d   :  { %165 = vsyncpa [#allocation4], 1 }

</bundles_post_ra>
